<compile_context>
chip_gen: v6e
topology: v6e:2x2x1
jax: 0.10.0
libtpu: 0.0.40
codegen_flags: <defaults>
</compile_context>

<pallas_src>
import jax
import jax.numpy as jnp
from jax.experimental import pallas as pl
from jax.experimental.pallas import tpu as pltpu


def attn_decoder_kernel(
    tok_ref,                                   # SMEM (1,) int32 : token index
    emb_hbm_ref,                               # ANY  (V, H)     : embedding table (HBM)
    hidden_ref,                                # VMEM (1, H)     : previous hidden state
    enc_ref,                                   # VMEM (L, H)     : encoder outputs
    w_attn_e_ref, w_attn_h_ref, b_attn_ref,    # (H, L), (H, L), (1, L)
    w_comb_e_ref, w_comb_a_ref, b_comb_ref,    # (H, H), (H, H), (1, H)
    w_ih_ref, b_ih_ref,                        # (H, 3H), (1, 3H)  gate order: r, z, n
    w_hh_ref, b_hh_ref,                        # (H, 3H), (1, 3H)
    w_out_ref, b_out_ref,                      # (H, V), (1, V)
    logp_ref,                                  # out (1, V)  log_softmax(out(h_new))
    newh_ref,                                  # out (1, H)  new hidden state
    attnw_ref,                                 # out (1, L)  attention weights
    emb_row_ref,                               # scratch VMEM (1, H)
    emb_sem,                                   # scratch DMA semaphore
):
    H = hidden_ref.shape[1]

    # --- gather exactly one embedding row from HBM (no full-table DMA) ---
    tok = tok_ref[0]
    emb_cp = pltpu.make_async_copy(emb_hbm_ref.at[pl.ds(tok, 1)], emb_row_ref, emb_sem)
    emb_cp.start()

    # --- hidden-side matmuls overlap the embedding-row DMA ---
    hidden = hidden_ref[...]                                        # (1, H)
    attn_h = jnp.dot(hidden, w_attn_h_ref[...],
                     preferred_element_type=jnp.float32)            # (1, L)
    gh = (jnp.dot(hidden, w_hh_ref[...],
                  preferred_element_type=jnp.float32)
          + b_hh_ref[...])                                          # (1, 3H)

    emb_cp.wait()
    embedded = emb_row_ref[...].astype(jnp.float32)                 # (1, H)
    # (dropout == identity in eval mode)

    # --- attention weights: softmax(W_attn @ [embedded; hidden] + b), concat-free ---
    attn_logits = (jnp.dot(embedded, w_attn_e_ref[...],
                           preferred_element_type=jnp.float32)
                   + attn_h + b_attn_ref[...])                      # (1, L)
    m = jnp.max(attn_logits, axis=1, keepdims=True)
    e = jnp.exp(attn_logits - m)
    attn_w = e * pl.reciprocal(jnp.sum(e, axis=1, keepdims=True))   # exact recip
    attnw_ref[...] = attn_w

    # --- attn_applied = attn_w @ encoder_outputs ---
    attn_applied = jnp.dot(attn_w, enc_ref[...],
                           preferred_element_type=jnp.float32)      # (1, H)

    # --- attn_combine + relu, concat-free ---
    combined = (jnp.dot(embedded, w_comb_e_ref[...],
                        preferred_element_type=jnp.float32)
                + jnp.dot(attn_applied, w_comb_a_ref[...],
                          preferred_element_type=jnp.float32)
                + b_comb_ref[...])                                  # (1, H)
    x = jnp.maximum(combined, 0.0)

    # --- single-step GRU (PyTorch gate order r, z, n) ---
    gi = (jnp.dot(x, w_ih_ref[...], preferred_element_type=jnp.float32)
          + b_ih_ref[...])                                          # (1, 3H)
    rz = jax.nn.sigmoid(gi[:, :2 * H] + gh[:, :2 * H])              # fused r|z
    r = rz[:, :H]
    z = rz[:, H:]
    n = jnp.tanh(gi[:, 2 * H:] + r * gh[:, 2 * H:])
    h_new = (1.0 - z) * n + z * hidden                              # (1, H)
    newh_ref[...] = h_new

    # --- output projection + log_softmax ---
    logits = (jnp.dot(h_new, w_out_ref[...],
                      preferred_element_type=jnp.float32)
              + b_out_ref[...])                                     # (1, V)
    lm = jnp.max(logits, axis=1, keepdims=True)
    shifted = logits - lm
    lse = jnp.log(jnp.sum(jnp.exp(shifted), axis=1, keepdims=True))
    logp_ref[...] = shifted - lse


def prepare_params(params, weight_dtype=jnp.float32):
    """One-time glue: PyTorch (out,in) -> (in,out), split concat-weights, 2-D biases.

    Do this ONCE at model-load time, not per decode step.
    """
    H = params["comb_w"].shape[0]
    w_attn = jnp.asarray(params["attn_w"]).T.astype(weight_dtype)   # (2H, L)
    w_comb = jnp.asarray(params["comb_w"]).T.astype(weight_dtype)   # (2H, H)
    return {
        "emb":      jnp.asarray(params["emb"]).astype(weight_dtype),          # (V, H)
        "w_attn_e": w_attn[:H],                                               # (H, L)
        "w_attn_h": w_attn[H:],                                               # (H, L)
        "b_attn":   jnp.asarray(params["attn_b"])[None, :].astype(jnp.float32),
        "w_comb_e": w_comb[:H],                                               # (H, H)
        "w_comb_a": w_comb[H:],                                               # (H, H)
        "b_comb":   jnp.asarray(params["comb_b"])[None, :].astype(jnp.float32),
        "w_ih":     jnp.asarray(params["gru_w_ih"]).T.astype(weight_dtype),   # (H, 3H)
        "b_ih":     jnp.asarray(params["gru_b_ih"])[None, :].astype(jnp.float32),
        "w_hh":     jnp.asarray(params["gru_w_hh"]).T.astype(weight_dtype),   # (H, 3H)
        "b_hh":     jnp.asarray(params["gru_b_hh"])[None, :].astype(jnp.float32),
        "w_out":    jnp.asarray(params["out_w"]).T.astype(weight_dtype),      # (H, V)
        "b_out":    jnp.asarray(params["out_b"])[None, :].astype(jnp.float32),
    }


@jax.jit
def attn_decoder_forward(token, hidden, encoder_outputs, prep):
    """token: () int32, hidden: (1,1,H) f32, encoder_outputs: (L,H) f32,
    prep: output of prepare_params()."""
    H = hidden.shape[-1]
    L = encoder_outputs.shape[0]
    V = prep["w_out"].shape[1]

    tok = jnp.reshape(token.astype(jnp.int32), (1,))
    h0 = hidden.reshape(1, H)

    smem = pl.BlockSpec(memory_space=pltpu.MemorySpace.SMEM)
    vmem = pl.BlockSpec(memory_space=pltpu.MemorySpace.VMEM)
    hbm = pl.BlockSpec(memory_space=pl.ANY)   # embedding table stays in HBM

    logp, h_new, attn_w = pl.pallas_call(
        attn_decoder_kernel,
        out_shape=(
            jax.ShapeDtypeStruct((1, V), jnp.float32),
            jax.ShapeDtypeStruct((1, H), jnp.float32),
            jax.ShapeDtypeStruct((1, L), jnp.float32),
        ),
        in_specs=[smem, hbm, vmem, vmem] + [vmem] * 12,
        out_specs=(vmem, vmem, vmem),
        scratch_shapes=[
            pltpu.VMEM((1, H), prep["emb"].dtype),   # single embedding row
            pltpu.SemaphoreType.DMA,                 # its DMA completion sem
        ],
    )(tok, prep["emb"], h0, encoder_outputs,
      prep["w_attn_e"], prep["w_attn_h"], prep["b_attn"],
      prep["w_comb_e"], prep["w_comb_a"], prep["b_comb"],
      prep["w_ih"], prep["b_ih"], prep["w_hh"], prep["b_hh"],
      prep["w_out"], prep["b_out"])

    return logp, h_new.reshape(1, 1, H), attn_w


def attn_decoder_reference(token, hidden, encoder_outputs, params):
    """Pure-JAX replica of the PyTorch forward (eval mode)."""
    H = hidden.shape[-1]
    embedded = params["emb"][token][None, :]                     # (1, H)
    h = hidden.reshape(1, H)
    cat_eh = jnp.concatenate([embedded, h], axis=1)
    attn_logits = cat_eh @ params["attn_w"].T + params["attn_b"]
    attn_w = jax.nn.softmax(attn_logits, axis=1)
    attn_applied = attn_w @ encoder_outputs
    cat_ea = jnp.concatenate([embedded, attn_applied], axis=1)
    x = jax.nn.relu(cat_ea @ params["comb_w"].T + params["comb_b"])
    gi = x @ params["gru_w_ih"].T + params["gru_b_ih"]
    gh = h @ params["gru_w_hh"].T + params["gru_b_hh"]
    r = jax.nn.sigmoid(gi[:, :H] + gh[:, :H])
    z = jax.nn.sigmoid(gi[:, H:2 * H] + gh[:, H:2 * H])
    n = jnp.tanh(gi[:, 2 * H:] + r * gh[:, 2 * H:])
    h_new = (1.0 - z) * n + z * h
    logits = h_new @ params["out_w"].T + params["out_b"]
    logp = jax.nn.log_softmax(logits, axis=1)
    return logp, h_new.reshape(1, 1, H), attn_w


def make_params(key, hidden_size, output_size, max_length):
    H, V, L = hidden_size, output_size, max_length
    ks = jax.random.split(key, 11)
    s = 0.1
    return {
        "emb":      jax.random.normal(ks[0], (V, H), jnp.float32),
        "attn_w":   jax.random.normal(ks[1], (L, 2 * H), jnp.float32) * s,
        "attn_b":   jax.random.normal(ks[2], (L,), jnp.float32) * s,
        "comb_w":   jax.random.normal(ks[3], (H, 2 * H), jnp.float32) * s,
        "comb_b":   jax.random.normal(ks[4], (H,), jnp.float32) * s,
        "gru_w_ih": jax.random.normal(ks[5], (3 * H, H), jnp.float32) * s,
        "gru_b_ih": jax.random.normal(ks[6], (3 * H,), jnp.float32) * s,
        "gru_w_hh": jax.random.normal(ks[7], (3 * H, H), jnp.float32) * s,
        "gru_b_hh": jax.random.normal(ks[8], (3 * H,), jnp.float32) * s,
        "out_w":    jax.random.normal(ks[9], (V, H), jnp.float32) * s,
        "out_b":    jax.random.normal(ks[10], (V,), jnp.float32) * s,
    }


if __name__ == "__main__":
    hidden_size = 32
    output_size = 64
    max_length = 16

    key = jax.random.PRNGKey(0)
    kp, kh, ke, kt = jax.random.split(key, 4)

    params = make_params(kp, hidden_size, output_size, max_length)
    prep = prepare_params(params)                                  # one-time glue

    token = jnp.array(7, dtype=jnp.int32)                          # decoder input token
    hidden = jax.random.normal(kh, (1, 1, hidden_size), jnp.float32)
    encoder_outputs = jax.random.normal(ke, (max_length, hidden_size), jnp.float32)

    logp, h_new, attn_w = attn_decoder_forward(token, hidden, encoder_outputs, prep)
    jax.block_until_ready((logp, h_new, attn_w))

    r_logp, r_h, r_aw = attn_decoder_reference(token, hidden, encoder_outputs, params)
    assert logp.shape == (1, output_size)
    assert h_new.shape == (1, 1, hidden_size)
    assert attn_w.shape == (1, max_length)
    assert jnp.allclose(logp, r_logp, atol=1e-5)
    assert jnp.allclose(h_new, r_h, atol=1e-5)
    assert jnp.allclose(attn_w, r_aw, atol=1e-5)

    print("KERNEL_OK")
</pallas_src>

<mosaic_0001>
module attributes {stable_mosaic.version = 11 : i64} {
  func.func @attn_decoder_kernel(%arg0: memref<1xi32, #tpu.memory_space<smem>>, %arg1: memref<64x32xf32, #tpu.memory_space<any>>, %arg2: memref<1x32xf32, #tpu.memory_space<vmem>>, %arg3: memref<16x32xf32, #tpu.memory_space<vmem>>, %arg4: memref<32x16xf32, #tpu.memory_space<vmem>>, %arg5: memref<32x16xf32, #tpu.memory_space<vmem>>, %arg6: memref<1x16xf32, #tpu.memory_space<vmem>>, %arg7: memref<32x32xf32, #tpu.memory_space<vmem>>, %arg8: memref<32x32xf32, #tpu.memory_space<vmem>>, %arg9: memref<1x32xf32, #tpu.memory_space<vmem>>, %arg10: memref<32x96xf32, #tpu.memory_space<vmem>>, %arg11: memref<1x96xf32, #tpu.memory_space<vmem>>, %arg12: memref<32x96xf32, #tpu.memory_space<vmem>>, %arg13: memref<1x96xf32, #tpu.memory_space<vmem>>, %arg14: memref<32x64xf32, #tpu.memory_space<vmem>>, %arg15: memref<1x64xf32, #tpu.memory_space<vmem>>, %arg16: memref<1x64xf32, #tpu.memory_space<vmem>>, %arg17: memref<1x32xf32, #tpu.memory_space<vmem>>, %arg18: memref<1x16xf32, #tpu.memory_space<vmem>>, %arg19: memref<1x32xf32, #tpu.memory_space<vmem>>, %arg20: memref<!tpu.dma_semaphore, #tpu.memory_space<semaphore_mem>>) attributes {dimension_semantics = [], scalar_prefetch = 0 : i64, scratch_operands = 2 : i64, tpu.core_type = #tpu.core_type<tc>} {
    %c0 = arith.constant 0 : index
    %0 = memref.load %arg0[%c0] : memref<1xi32, #tpu.memory_space<smem>>
    %c0_i32 = arith.constant 0 : i32
    %1 = tpu.memref_slice %arg1[%0, %c0_i32] : memref<64x32xf32, #tpu.memory_space<any>> -> memref<1x32xf32, #tpu.memory_space<any>>
    tpu.enqueue_dma source(%1 : memref<1x32xf32, #tpu.memory_space<any>>) target(%arg19 : memref<1x32xf32, #tpu.memory_space<vmem>>) target_semaphore(%arg20 : memref<!tpu.dma_semaphore, #tpu.memory_space<semaphore_mem>>)
    %c0_0 = arith.constant 0 : index
    %c0_1 = arith.constant 0 : index
    %2 = vector.load %arg2[%c0_0, %c0_1] : memref<1x32xf32, #tpu.memory_space<vmem>>, vector<1x32xf32>
    %c0_2 = arith.constant 0 : index
    %c0_3 = arith.constant 0 : index
    %3 = vector.load %arg5[%c0_2, %c0_3] : memref<32x16xf32, #tpu.memory_space<vmem>>, vector<32x16xf32>
    %cst = arith.constant dense<0.000000e+00> : vector<1x16xf32>
    %4 = tpu.matmul %2, %3, %cst {dimension_numbers = #tpu.dot_dimension_numbers<[1], [0], [0], [1], [0, 0, 1, 1], [], []>} : vector<1x32xf32>, vector<32x16xf32>, vector<1x16xf32> -> vector<1x16xf32>
    %c0_4 = arith.constant 0 : index
    %c0_5 = arith.constant 0 : index
    %5 = vector.load %arg12[%c0_4, %c0_5] : memref<32x96xf32, #tpu.memory_space<vmem>>, vector<32x96xf32>
    %cst_6 = arith.constant dense<0.000000e+00> : vector<1x96xf32>
    %6 = tpu.matmul %2, %5, %cst_6 {dimension_numbers = #tpu.dot_dimension_numbers<[1], [0], [0], [1], [0, 0, 1, 1], [], []>} : vector<1x32xf32>, vector<32x96xf32>, vector<1x96xf32> -> vector<1x96xf32>
    %c0_7 = arith.constant 0 : index
    %c0_8 = arith.constant 0 : index
    %7 = vector.load %arg13[%c0_7, %c0_8] : memref<1x96xf32, #tpu.memory_space<vmem>>, vector<1x96xf32>
    %8 = arith.addf %6, %7 : vector<1x96xf32>
    %c0_i32_9 = arith.constant 0 : i32
    %9 = tpu.memref_slice %arg1[%0, %c0_i32_9] : memref<64x32xf32, #tpu.memory_space<any>> -> memref<1x32xf32, #tpu.memory_space<any>>
    tpu.wait_dma2 semaphore(%arg20 : memref<!tpu.dma_semaphore, #tpu.memory_space<semaphore_mem>>) src(%9 : memref<1x32xf32, #tpu.memory_space<any>>) dst(%arg19 : memref<1x32xf32, #tpu.memory_space<vmem>>)
    %c0_10 = arith.constant 0 : index
    %c0_11 = arith.constant 0 : index
    %10 = vector.load %arg19[%c0_10, %c0_11] : memref<1x32xf32, #tpu.memory_space<vmem>>, vector<1x32xf32>
    %c0_12 = arith.constant 0 : index
    %c0_13 = arith.constant 0 : index
    %11 = vector.load %arg4[%c0_12, %c0_13] : memref<32x16xf32, #tpu.memory_space<vmem>>, vector<32x16xf32>
    %cst_14 = arith.constant dense<0.000000e+00> : vector<1x16xf32>
    %12 = tpu.matmul %10, %11, %cst_14 {dimension_numbers = #tpu.dot_dimension_numbers<[1], [0], [0], [1], [0, 0, 1, 1], [], []>} : vector<1x32xf32>, vector<32x16xf32>, vector<1x16xf32> -> vector<1x16xf32>
    %13 = arith.addf %12, %4 : vector<1x16xf32>
    %c0_15 = arith.constant 0 : index
    %c0_16 = arith.constant 0 : index
    %14 = vector.load %arg6[%c0_15, %c0_16] : memref<1x16xf32, #tpu.memory_space<vmem>>, vector<1x16xf32>
    %15 = arith.addf %13, %14 : vector<1x16xf32>
    %cst_17 = arith.constant dense<0xFF800000> : vector<1xf32>
    %16 = vector.multi_reduction <maximumf>, %15, %cst_17 [1] : vector<1x16xf32> to vector<1xf32>
    %17 = vector.shape_cast %16 : vector<1xf32> to vector<1x1xf32>
    %18 = vector.broadcast %17 : vector<1x1xf32> to vector<1x16xf32>
    %19 = arith.subf %15, %18 : vector<1x16xf32>
    %20 = math.exp %19 : vector<1x16xf32>
    %cst_18 = arith.constant dense<0.000000e+00> : vector<1xf32>
    %21 = vector.multi_reduction <add>, %20, %cst_18 [1] : vector<1x16xf32> to vector<1xf32>
    %22 = vector.shape_cast %21 : vector<1xf32> to vector<1x1xf32>
    %23 = tpu.reciprocal %22 : vector<1x1xf32> -> vector<1x1xf32>
    %24 = vector.broadcast %23 : vector<1x1xf32> to vector<1x16xf32>
    %25 = arith.mulf %20, %24 : vector<1x16xf32>
    %c0_19 = arith.constant 0 : index
    %c0_20 = arith.constant 0 : index
    %26 = vector.load %arg18[%c0_19, %c0_20] : memref<1x16xf32, #tpu.memory_space<vmem>>, vector<1x16xf32>
    tpu.vector_store %arg18[%c0_19, %c0_20], %25 {strides = array<i32>} : memref<1x16xf32, #tpu.memory_space<vmem>>, vector<1x16xf32>,
    %c0_21 = arith.constant 0 : index
    %c0_22 = arith.constant 0 : index
    %27 = vector.load %arg3[%c0_21, %c0_22] : memref<16x32xf32, #tpu.memory_space<vmem>>, vector<16x32xf32>
    %cst_23 = arith.constant dense<0.000000e+00> : vector<1x32xf32>
    %28 = tpu.matmul %25, %27, %cst_23 {dimension_numbers = #tpu.dot_dimension_numbers<[1], [0], [0], [1], [0, 0, 1, 1], [], []>} : vector<1x16xf32>, vector<16x32xf32>, vector<1x32xf32> -> vector<1x32xf32>
    %c0_24 = arith.constant 0 : index
    %c0_25 = arith.constant 0 : index
    %29 = vector.load %arg7[%c0_24, %c0_25] : memref<32x32xf32, #tpu.memory_space<vmem>>, vector<32x32xf32>
    %cst_26 = arith.constant dense<0.000000e+00> : vector<1x32xf32>
    %30 = tpu.matmul %10, %29, %cst_26 {dimension_numbers = #tpu.dot_dimension_numbers<[1], [0], [0], [1], [0, 0, 1, 1], [], []>} : vector<1x32xf32>, vector<32x32xf32>, vector<1x32xf32> -> vector<1x32xf32>
    %c0_27 = arith.constant 0 : index
    %c0_28 = arith.constant 0 : index
    %31 = vector.load %arg8[%c0_27, %c0_28] : memref<32x32xf32, #tpu.memory_space<vmem>>, vector<32x32xf32>
    %cst_29 = arith.constant dense<0.000000e+00> : vector<1x32xf32>
    %32 = tpu.matmul %28, %31, %cst_29 {dimension_numbers = #tpu.dot_dimension_numbers<[1], [0], [0], [1], [0, 0, 1, 1], [], []>} : vector<1x32xf32>, vector<32x32xf32>, vector<1x32xf32> -> vector<1x32xf32>
    %33 = arith.addf %30, %32 : vector<1x32xf32>
    %c0_30 = arith.constant 0 : index
    %c0_31 = arith.constant 0 : index
    %34 = vector.load %arg9[%c0_30, %c0_31] : memref<1x32xf32, #tpu.memory_space<vmem>>, vector<1x32xf32>
    %35 = arith.addf %33, %34 : vector<1x32xf32>
    %cst_32 = arith.constant 0.000000e+00 : f32
    %36 = vector.broadcast %cst_32 : f32 to vector<1x32xf32>
    %37 = arith.maximumf %35, %36 : vector<1x32xf32>
    %c0_33 = arith.constant 0 : index
    %c0_34 = arith.constant 0 : index
    %38 = vector.load %arg10[%c0_33, %c0_34] : memref<32x96xf32, #tpu.memory_space<vmem>>, vector<32x96xf32>
    %cst_35 = arith.constant dense<0.000000e+00> : vector<1x96xf32>
    %39 = tpu.matmul %37, %38, %cst_35 {dimension_numbers = #tpu.dot_dimension_numbers<[1], [0], [0], [1], [0, 0, 1, 1], [], []>} : vector<1x32xf32>, vector<32x96xf32>, vector<1x96xf32> -> vector<1x96xf32>
    %c0_36 = arith.constant 0 : index
    %c0_37 = arith.constant 0 : index
    %40 = vector.load %arg11[%c0_36, %c0_37] : memref<1x96xf32, #tpu.memory_space<vmem>>, vector<1x96xf32>
    %41 = arith.addf %39, %40 : vector<1x96xf32>
    %42 = vector.extract_strided_slice %41 {offsets = [0, 0], sizes = [1, 64], strides = [1, 1]} : vector<1x96xf32> to vector<1x64xf32>
    %43 = vector.extract_strided_slice %8 {offsets = [0, 0], sizes = [1, 64], strides = [1, 1]} : vector<1x96xf32> to vector<1x64xf32>
    %44 = arith.addf %42, %43 : vector<1x64xf32>
    %45 = arith.negf %44 : vector<1x64xf32>
    %46 = math.exp %45 : vector<1x64xf32>
    %cst_38 = arith.constant 1.000000e+00 : f32
    %47 = vector.broadcast %cst_38 : f32 to vector<1x64xf32>
    %48 = arith.addf %47, %46 : vector<1x64xf32>
    %49 = arith.divf %47, %48 : vector<1x64xf32>
    %50 = vector.extract_strided_slice %49 {offsets = [0, 0], sizes = [1, 32], strides = [1, 1]} : vector<1x64xf32> to vector<1x32xf32>
    %51 = vector.extract_strided_slice %49 {offsets = [0, 32], sizes = [1, 32], strides = [1, 1]} : vector<1x64xf32> to vector<1x32xf32>
    %52 = vector.extract_strided_slice %41 {offsets = [0, 64], sizes = [1, 32], strides = [1, 1]} : vector<1x96xf32> to vector<1x32xf32>
    %53 = vector.extract_strided_slice %8 {offsets = [0, 64], sizes = [1, 32], strides = [1, 1]} : vector<1x96xf32> to vector<1x32xf32>
    %54 = arith.mulf %50, %53 : vector<1x32xf32>
    %55 = arith.addf %52, %54 : vector<1x32xf32>
    %56 = math.tanh %55 : vector<1x32xf32>
    %cst_39 = arith.constant 1.000000e+00 : f32
    %57 = vector.broadcast %cst_39 : f32 to vector<1x32xf32>
    %58 = arith.subf %57, %51 : vector<1x32xf32>
    %59 = arith.mulf %58, %56 : vector<1x32xf32>
    %60 = arith.mulf %51, %2 : vector<1x32xf32>
    %61 = arith.addf %59, %60 : vector<1x32xf32>
    %c0_40 = arith.constant 0 : index
    %c0_41 = arith.constant 0 : index
    %62 = vector.load %arg17[%c0_40, %c0_41] : memref<1x32xf32, #tpu.memory_space<vmem>>, vector<1x32xf32>
    tpu.vector_store %arg17[%c0_40, %c0_41], %61 {strides = array<i32>} : memref<1x32xf32, #tpu.memory_space<vmem>>, vector<1x32xf32>,
    %c0_42 = arith.constant 0 : index
    %c0_43 = arith.constant 0 : index
    %63 = vector.load %arg14[%c0_42, %c0_43] : memref<32x64xf32, #tpu.memory_space<vmem>>, vector<32x64xf32>
    %cst_44 = arith.constant dense<0.000000e+00> : vector<1x64xf32>
    %64 = tpu.matmul %61, %63, %cst_44 {dimension_numbers = #tpu.dot_dimension_numbers<[1], [0], [0], [1], [0, 0, 1, 1], [], []>} : vector<1x32xf32>, vector<32x64xf32>, vector<1x64xf32> -> vector<1x64xf32>
    %c0_45 = arith.constant 0 : index
    %c0_46 = arith.constant 0 : index
    %65 = vector.load %arg15[%c0_45, %c0_46] : memref<1x64xf32, #tpu.memory_space<vmem>>, vector<1x64xf32>
    %66 = arith.addf %64, %65 : vector<1x64xf32>
    %cst_47 = arith.constant dense<0xFF800000> : vector<1xf32>
    %67 = vector.multi_reduction <maximumf>, %66, %cst_47 [1] : vector<1x64xf32> to vector<1xf32>
    %68 = vector.shape_cast %67 : vector<1xf32> to vector<1x1xf32>
    %69 = vector.broadcast %68 : vector<1x1xf32> to vector<1x64xf32>
    %70 = arith.subf %66, %69 : vector<1x64xf32>
    %71 = math.exp %70 : vector<1x64xf32>
    %cst_48 = arith.constant dense<0.000000e+00> : vector<1xf32>
    %72 = vector.multi_reduction <add>, %71, %cst_48 [1] : vector<1x64xf32> to vector<1xf32>
    %73 = vector.shape_cast %72 : vector<1xf32> to vector<1x1xf32>
    %74 = math.log %73 : vector<1x1xf32>
    %75 = vector.broadcast %74 : vector<1x1xf32> to vector<1x64xf32>
    %76 = arith.subf %70, %75 : vector<1x64xf32>
    %c0_49 = arith.constant 0 : index
    %c0_50 = arith.constant 0 : index
    %77 = vector.load %arg16[%c0_49, %c0_50] : memref<1x64xf32, #tpu.memory_space<vmem>>, vector<1x64xf32>
    tpu.vector_store %arg16[%c0_49, %c0_50], %76 {strides = array<i32>} : memref<1x64xf32, #tpu.memory_space<vmem>>, vector<1x64xf32>,
    return
  }
}

</mosaic_0001>

<bundles_post_ra>
// kernel: attn_decoder_forward.1
= control target key start
LH: loop header
LB: loop body
LE: loop exit
PB: predicated region body
PF: predicated region fallthrough
CT: control target
= control target key end

     0   :  { %s1475_s0 = inlined_call_operand.<no memory space> [shape: s32[1], index: 0, kind: input, shape index: {}]   ;;  %s1476_s1 = inlined_call_operand.vmem [shape: f32[64,32], index: 1, kind: input, shape index: {}]   ;;  %s1477_s2 = inlined_call_operand.vmem [shape: f32[1,32], index: 2, kind: input, shape index: {}]   ;;  %s1478_s3 = inlined_call_operand.hbm [shape: f32[16,32], index: 3, kind: input, shape index: {}]   ;;  %s1479_s4 = inlined_call_operand.vmem [shape: f32[32,16], index: 4, kind: input, shape index: {}]   ;;  %s1480_s5 = inlined_call_operand.vmem [shape: f32[32,16], index: 5, kind: input, shape index: {}]   ;;  %s1481_s6 = inlined_call_operand.vmem [shape: f32[1,16], index: 6, kind: input, shape index: {}]   ;;  %s1482_s7 = inlined_call_operand.vmem [shape: f32[32,32], index: 7, kind: input, shape index: {}]   ;;  %s1483_s8 = inlined_call_operand.vmem [shape: f32[32,32], index: 8, kind: input, shape index: {}]   ;;  %s1484_s9 = inlined_call_operand.vmem [shape: f32[1,32], index: 9, kind: input, shape index: {}]   ;;  %s1485_s10 = inlined_call_operand.vmem [shape: f32[32,96], index: 10, kind: input, shape index: {}]   ;;  %s1486_s11 = inlined_call_operand.vmem [shape: f32[1,96], index: 11, kind: input, shape index: {}]   ;;  %s1487_s12 = inlined_call_operand.vmem [shape: f32[32,96], index: 12, kind: input, shape index: {}]   ;;  %s1488_s13 = inlined_call_operand.hbm [shape: f32[1,96], index: 13, kind: input, shape index: {}]   ;;  %s1489_s14 = inlined_call_operand.vmem [shape: f32[32,64], index: 14, kind: input, shape index: {}]   ;;  %s1490_s15 = inlined_call_operand.hbm [shape: f32[1,64], index: 15, kind: input, shape index: {}]   ;;  %s1491_s16 = inlined_call_operand.hbm [shape: f32[1,64], index: 16, kind: output, shape index: {0}]   ;;  %s1492_s17 = inlined_call_operand.hbm [shape: f32[1,32], index: 17, kind: output, shape index: {1}]   ;;  %s1493_s18 = inlined_call_operand.hbm [shape: f32[1,16], index: 18, kind: output, shape index: {2}]  }
   0x1   :  { %1494 = sst [smem:[#allocation21_spill]] %s1475_s0 }
   0x2   :  { %1495 = sst [smem:[#allocation22_spill]] %s1476_s1 }
   0x3   :  { %1496 = sst [smem:[#allocation23_spill]] %s1477_s2 }
   0x4   :  { %25 = vsyncpa [#allocation6], 0 }
   0x5   :  { %26 = vsyncpa [#allocation9], 0 }
   0x6   :  { %27 = vsyncpa [#allocation7], 0 }
   0x7   :  { %28 = vsyncpa [#allocation13], 0  ;;  %s1179_s27 = smov [#allocation8]   ;;  %s1180_s29 = smov [#allocation5]  }
   0x8   :  { %s69_s28 = sshll.u32 %s1179_s27, 4  ;;  %s38_s30 = sshll.u32 %s1180_s29, 4  ;;  %s70_s28 = int_to_ptr.vmem [resolvable:$true] %s69_s28  ;;  %s39_s30 = int_to_ptr.vmem [resolvable:$true] %s38_s30 }
   0x9   :  { %s1057_s0 = scalar_lea.vmem %s70_s28, 16  ;;  %s1061_s19 = scalar_lea.vmem %s70_s28, 32 }
   0xa   :  { %p1058_p0 = scmp.ne.s32.totalorder %s70_s28, %s1057_s0  ;;  %p1062_p1 = scmp.lt.s32.totalorder %s70_s28, %s70_s28 }
   0xb   :  { %p1063_p2 = scmp.lt.s32.totalorder %s1061_s19, %s1057_s0 }
   0xd   :  { %p1064_p3 = por %p1063_p2, %p1062_p1 }
   0xf   :  { %p1065_p4 = pnand %p1064_p3, %p1058_p0 }
  0x11   :  { %1068 = shalt.err (!%p1065_p4)
}
  0x12   :  { %72 = dma.hbm_to_vmem [thread:$0]  %s1488_s13, 16, %s70_s28, [#allocation9]  }
  0x13   :  { %s1077_s21 = scalar_lea.vmem %s39_s30, 256  ;;  %p1082_p6 = scmp.lt.s32.totalorder %s39_s30, %s39_s30 }
  0x14   :  { %p1078_p5 = scmp.ne.s32.totalorder %s39_s30, %s1077_s21  ;;  %p1083_p7 = scmp.lt.s32.totalorder %s1077_s21, %s1077_s21 }
  0x16   :  { %p1084_p8 = por %p1083_p7, %p1082_p6 }
  0x18   :  { %p1085_p9 = pnand %p1084_p8, %p1078_p5 }
  0x1a   :  { %1088 = shalt.err (!%p1085_p9)
}
  0x1b   :  { %s1181_s22 = smov 128   ;;  %s1182_s2 = smov 8  }
  0x1c   :  { %44 = dma.hbm_to_vmem [thread:$0]  %s1478_s3, 256, %s39_s30, [#allocation6], %s1181_s22, %s1181_s22, %s1182_s2  }
  0x1d   :  { %s1183_s25 = smov [#allocation10]  }
  0x1e   :  { %s81_s26 = sshll.u32 %s1183_s25, 4  ;;  %s82_s26 = int_to_ptr.vmem [resolvable:$true] %s81_s26 }
  0x1f   :  { %s1097_s27 = scalar_lea.vmem %s82_s26, 16  ;;  %s1101_s29 = scalar_lea.vmem %s82_s26, 32 }
  0x20   :  { %p1098_p10 = scmp.ne.s32.totalorder %s82_s26, %s1097_s27  ;;  %p1102_p11 = scmp.lt.s32.totalorder %s82_s26, %s82_s26 }
  0x21   :  { %p1103_p12 = scmp.lt.s32.totalorder %s1101_s29, %s1097_s27 }
  0x23   :  { %p1104_p13 = por %p1103_p12, %p1102_p11 }
  0x25   :  { %p1105_p0 = pnand %p1104_p13, %p1098_p10 }
  0x27   :  { %1108 = shalt.err (!%p1105_p0)
}
  0x28   :  { %84 = dma.hbm_to_vmem [thread:$0]  %s1490_s15, 16, %s82_s26, [#allocation9]  }
  0x29   :  { %1169 = dma.done.wait [#allocation6], 256  }
  0x2a   :  { %1170 = vsyncadd [#allocation6], 4294967040 }
  0x2b   :  { %1171 = dma.done.wait [#allocation9], 32  }
  0x2c   :  { %1172 = vsyncadd [#allocation9], 4294967264  ;;  %s1497_s0 = sld [smem:[#allocation21_spill]] }
  0x2d   :  { %s1498_s20 = sld [smem:[#allocation22_spill]] }
  0x33   :  { %s95_s21 = scalar_lea.vmem %s1498_s20, %s1497_s0 }
  0x34   :  { %v114_v0 = vld [vmem:[%s95_s21] sm:$0x1] }
  0x35   :  { %115 = vst [vmem:[#allocation2] sm:$0x1] %v114_v0 }
  0x36   :  { %141 = vsyncadd [#allocation3], 16  ;;  %v146_v1 = vld [vmem:[%s1480_s5 + $0x18] sm:$0xff]  ;;  %v1184_v3 = vmov 0.0   ;;  %v145_v4 = vld [vmem:[%s1480_s5 + $0x10] sm:$0xff]  ;;  %s1499_s22 = sld [smem:[#allocation23_spill]] }
  0x37   :  { %v224_v2 = vld [vmem:[%s1487_s12 + $0x18] sm:$0xff]  ;;  %938 = vmatprep.subr.mxu0 %v1184_v3  ;;  %949 = vmatprep.subr.mxu1 %v1184_v3  ;;  %v223_v5 = vld [vmem:[%s1487_s12 + $0x10] sm:$0xff]  ;;  %v144_v6 = vld [vmem:[%s1480_s5 + $0x8] sm:$0xff]  ;;  %vm147_vm0 = vcmask 261120   ;;  %vm1185_vm1 = vmmov 0  }
  0x38   :  { %939 = vmatpush3.msra.mxu0 %v146_v1  ;;  %950 = vmatpush3.msra.mxu1 %v224_v2  ;;  %v222_v7 = vld [vmem:[%s1487_s12 + $0x8] sm:$0xff]  ;;  %v143_v8 = vld [vmem:[%s1480_s5] sm:$0xff]  ;;  %v225_v11 = vld [vmem:[#allocation8] sm:$0x1] }
  0x39   :  { %940 = vmatprep.subr.mxu0 %v1184_v3  ;;  %951 = vmatprep.subr.mxu1 %v1184_v3  ;;  %v221_v9 = vld [vmem:[%s1487_s12] sm:$0xff] }
  0x3a   :  { %941 = vmatpush3.msra.mxu0 %v145_v4  ;;  %952 = vmatpush3.msra.mxu1 %v223_v5 }
  0x3b   :  { %942 = vmatprep.subr.mxu0 %v1184_v3  ;;  %953 = vmatprep.subr.mxu1 %v1184_v3 }
  0x3c   :  { %943 = vmatpush3.msra.mxu0 %v144_v6  ;;  %954 = vmatpush3.msra.mxu1 %v222_v7  ;;  %v1337_v10 = vld [vmem:[%s1499_s22] sm:$0x1] }
  0x3d   :  { %944 = vmatprep.subr.mxu0 %v1184_v3  ;;  %955 = vmatprep.subr.mxu1 %v1184_v3 }
  0x3e   :  { %945 = vmatpush3.msra.mxu0 %v143_v8  ;;  %946 = vmatprep.mubr.msk.f32.mxu0 %vm1185_vm1, %v1184_v3 }
  0x3f   :  { %956 = vmatpush3.msra.mxu1 %v221_v9  ;;  %957 = vmatprep.mubr.msk.f32.mxu1 %vm1185_vm1, %v1184_v3 }
  0x40   :  { %947 = vmatmul.mubr.msk.f32.vlgmr.msra.gmra.mxu0 %vm147_vm0, %v1337_v10  ;;  %958 = vmatmul.mubr.msk.f32.vlgmr.msra.gmra.mxu1 %vm147_vm0, %v1337_v10 }
 0x100   :  { %v217_v12 = vpop.f32.mrf.mxu0  ;;  %v292_v13 = vpop.f32.mrf.mxu1 }
 0x101   :  { %v1347_v14 = vadd.f32 %v292_v13, %v225_v11 }
 0x102   :  { %v948_v15 = vpop.f32.mrf.mxu0  ;;  %v959_v16 = vpop.f32.mrf.mxu1 }
 0x103   :  { %1173 = dma.done.wait [#allocation3], 16 }
 0x104   :  { %1174 = vsyncadd [#allocation3], 4294967280  ;;  %960 = vmatprep.subr.mxu0 %v1184_v3  ;;  %968 = vmatprep.mubr.msk.f32.mxu0 %vm1185_vm1, %v1184_v3  ;;  %v303_v17 = vld [vmem:[%s1479_s4 + $0x18] sm:$0xff]  ;;  %v302_v18 = vld [vmem:[%s1479_s4 + $0x10] sm:$0xff]  ;;  %vm379_vm2 = vcmask 122880   ;;  %vm394_vm3 = vcmask 130048   ;;  %v724_v5 = vlaneseq }
 0x105   :  { %971 = vmatprep.subr.mxu1 %v1184_v3  ;;  %975 = vmatprep.mubr.msk.f32.mxu1 %vm1185_vm1, %v1184_v3  ;;  %v301_v19 = vld [vmem:[%s1479_s4 + $0x8] sm:$0xff]  ;;  %v300_v20 = vld [vmem:[%s1479_s4] sm:$0xff]  ;;  %v471_v35 = vld [vmem:[%s1482_s7 + $0x18] sm:$0xff]  ;;  %s1186_s4 = smov 64   ;;  %s1188_s21 = smov 96   ;;  %vm737_vm4 = vcmask 253952  }
 0x106   :  { %961 = vmatpush3.msra.mxu0 %v303_v17  ;;  %v299_v21 = vld [vmem:[#allocation2] sm:$0x1]  ;;  %v393_v33 = vld [vmem:[#allocation5 + $0x8] sm:$0xff]  ;;  %v392_v34 = vld [vmem:[#allocation5] sm:$0xff]  ;;  %708 = vrot.lane.b32.xlu1 %v1347_v14, %s1186_s4  ;;  %v725_v6 = vshrl.u32 %v724_v5, 7  ;;  %vm816_vm5 = vcmask 516096  }
 0x107   :  { %962 = vmatprep.subr.mxu0 %v1184_v3  ;;  %v377_v23 = vld [vmem:[%s1481_s6] sm:$0x1]  ;;  %972 = vmatpush3.msra.mxu1 %v393_v33  ;;  %v470_v36 = vld [vmem:[%s1482_s7 + $0x10] sm:$0xff]  ;;  %v469_v37 = vld [vmem:[%s1482_s7 + $0x8] sm:$0xff] }
 0x108   :  { %963 = vmatpush3.msra.mxu0 %v302_v18  ;;  %973 = vmatprep.subr.mxu1 %v1184_v3  ;;  %v468_v38 = vld [vmem:[%s1482_s7] sm:$0xff]  ;;  %v475_v42 = vld [vmem:[%s1483_s8 + $0x18] sm:$0xff]  ;;  %v474_v43 = vld [vmem:[%s1483_s8 + $0x10] sm:$0xff]  ;;  %v726_v8 = vsub.s32 0, %v725_v6 }
 0x109   :  { %964 = vmatprep.subr.mxu0 %v1184_v3  ;;  %974 = vmatpush3.msra.mxu1 %v392_v34  ;;  %v473_v44 = vld [vmem:[%s1483_s8 + $0x8] sm:$0xff]  ;;  %v472_v45 = vld [vmem:[%s1483_s8] sm:$0xff]  ;;  %v625_v50 = vld [vmem:[%s1485_s10 + $0x18] sm:$0xff] }
 0x10a   :  { %965 = vmatpush3.msra.mxu0 %v301_v19  ;;  %978 = vmatprep.subr.mxu1 %v1184_v3  ;;  %v624_v51 = vld [vmem:[%s1485_s10 + $0x10] sm:$0xff]  ;;  %v623_v52 = vld [vmem:[%s1485_s10 + $0x8] sm:$0xff]  ;;  %v622_v53 = vld [vmem:[%s1485_s10] sm:$0xff] }
 0x10b   :  { %966 = vmatprep.subr.mxu0 %v1184_v3  ;;  %v619_v55 = vld [vmem:[%s1484_s9] sm:$0x1]  ;;  %s1187_s9 = smov 32   ;;  %v741_v16 = vld [vmem:[%s1489_s14 + $0x10] sm:$0xff] }
 0x10c   :  { %967 = vmatpush3.msra.mxu0 %v300_v20  ;;  %v626_v60 = vld [vmem:[%s1486_s11] sm:$0x1] }
 0x10d   :  { %969 = vmatmul.mubr.msk.f32.vlgmr.msra.gmra.mxu0 %vm147_vm0, %v299_v21  ;;  %989 = vmatprep.subr.mxu0 %v1184_v3  ;;  %v739_v17 = vld [vmem:[%s1489_s14] sm:$0xff] }
 0x10e   :  { %997 = vmatprep.mubr.msk.f32.mxu0 %vm1185_vm1, %v1184_v3  ;;  %990 = vmatpush3.msra.mxu0 %v471_v35 }
 0x10f   :  { %991 = vmatprep.subr.mxu0 %v1184_v3 }
 0x110   :  { %992 = vmatpush3.msra.mxu0 %v470_v36 }
 0x111   :  { %993 = vmatprep.subr.mxu0 %v1184_v3 }
 0x112   :  { %994 = vmatpush3.msra.mxu0 %v469_v37 }
 0x113   :  { %995 = vmatprep.subr.mxu0 %v1184_v3 }
 0x114   :  { %996 = vmatpush3.msra.mxu0 %v468_v38 }
 0x115   :  { %998 = vmatmul.mubr.msk.f32.vlgmr.msra.gmra.mxu0 %vm147_vm0, %v299_v21  ;;  %1011 = vmatprep.subr.mxu0 %v1184_v3 }
 0x116   :  { %1019 = vmatprep.mubr.msk.f32.mxu0 %vm1185_vm1, %v1184_v3 }
 0x178   :  { %v709_v7 = vpop.permute.xlu1 %708 }
 0x1cd   :  { %v373_v22 = vpop.f32.mrf.mxu0 }
 0x1ce   :  { %v374_v24 = vadd.f32 %v373_v22, %v217_v12  ;;  %v727_v12 = vrot.slane %v1337_v10, %v726_v8  ;;  %v740_v10 = vld [vmem:[%s1489_s14 + $0x8] sm:$0xff] }
 0x1cf   :  { %v970_v25 = vpop.f32.mrf.mxu0 }
 0x1d0   :  { %v378_v26 = vadd.f32 %v377_v23, %v374_v24 }
 0x1d2   :  { %v380_v27 = vsel %vm379_vm2, %v378_v26, -inf }
 0x1d3   :  { %381 = vmax.xlane.f32.xlu0 %v380_v27 }
 0x1d5   :  { %v615_v46 = vpop.f32.mrf.mxu0 }
 0x1d7   :  { %v999_v47 = vpop.f32.mrf.mxu0 }
 0x25c   :  { %v382_v28 = vpop.xlane.xlu0 %381 }
 0x25d   :  { %v383_v29 = vsub.f32 %v378_v26, %v382_v28  ;;  %v743_v26 = vld [vmem:[#allocation10] sm:$0x1] }
 0x25f   :  { %v384_v30 = vmul.f32 1.442695, %v383_v29 }
 0x261   :  { %1035 = vpow2.f32 %v384_v30 }
 0x26e   :  { %v1036_v31 = vpop.eup %1035 }
 0x26f   :  { %v386_v32 = vsel %vm379_vm2, %v1036_v31, 0.0 }
 0x270   :  { %387 = vadd.xlane.f32.xlu0 %v386_v32 }
 0x2f9   :  { %v388_v39 = vpop.xlane.xlu0 %387 }
 0x2fa   :  { %1037 = vrcp.f32 %v388_v39 }
 0x307   :  { %v1038_v40 = vpop.eup %1037 }
 0x308   :  { %v390_v41 = vmul.f32 %v1038_v40, %v1036_v31 }
 0x30a   :  { %976 = vmatmul.mubr.msk.f32.vlgmr.msra.gmra.mxu1 %vm394_vm3, %v390_v41  ;;  %391 = vst.msk [vmem:[#allocation14] sm:$0x1] %vm379_vm2, %v390_v41 }
 0x30b   :  { %979 = vmatpush3.msra.mxu1 %v475_v42  ;;  %986 = vmatprep.mubr.msk.f32.mxu1 %vm1185_vm1, %v1184_v3 }
 0x30c   :  { %980 = vmatprep.subr.mxu1 %v1184_v3 }
 0x30d   :  { %981 = vmatpush3.msra.mxu1 %v474_v43 }
 0x30e   :  { %982 = vmatprep.subr.mxu1 %v1184_v3 }
 0x30f   :  { %983 = vmatpush3.msra.mxu1 %v473_v44 }
 0x310   :  { %984 = vmatprep.subr.mxu1 %v1184_v3 }
 0x311   :  { %985 = vmatpush3.msra.mxu1 %v472_v45 }
 0x312   :  { %1000 = vmatprep.subr.mxu1 %v1184_v3 }
 0x3ca   :  { %v464_v48 = vpop.f32.mrf.mxu1 }
 0x3cb   :  { %987 = vmatmul.mubr.msk.f32.vlgmr.msra.gmra.mxu1 %vm147_vm0, %v464_v48 }
 0x3cc   :  { %v977_v49 = vpop.f32.mrf.mxu1  ;;  %1008 = vmatprep.mubr.msk.f32.mxu1 %vm1185_vm1, %v1184_v3  ;;  %1001 = vmatpush3.msra.mxu1 %v625_v50 }
 0x3cd   :  { %1002 = vmatprep.subr.mxu1 %v1184_v3 }
 0x3ce   :  { %1003 = vmatpush3.msra.mxu1 %v624_v51 }
 0x3cf   :  { %1004 = vmatprep.subr.mxu1 %v1184_v3 }
 0x3d0   :  { %1005 = vmatpush3.msra.mxu1 %v623_v52 }
 0x3d1   :  { %1006 = vmatprep.subr.mxu1 %v1184_v3 }
 0x3d2   :  { %1007 = vmatpush3.msra.mxu1 %v622_v53 }
 0x48b   :  { %v545_v54 = vpop.f32.mrf.mxu1 }
 0x48c   :  { %v616_v56 = vadd.f32 %v615_v46, %v545_v54 }
 0x48d   :  { %v988_v57 = vpop.f32.mrf.mxu1 }
 0x48e   :  { %v620_v58 = vadd.f32 %v619_v55, %v616_v56 }
 0x490   :  { %v621_v59 = vmax.f32 %v620_v58, 0.0 }
 0x492   :  { %1009 = vmatmul.mubr.msk.f32.vlgmr.msra.gmra.mxu1 %vm147_vm0, %v621_v59 }
 0x552   :  { %v696_v61 = vpop.f32.mrf.mxu1 }
 0x553   :  { %v697_v62 = vadd.f32 %v696_v61, %v626_v60 }
 0x554   :  { %v1010_v63 = vpop.f32.mrf.mxu1 }
 0x555   :  { %v700_v0 = vadd.f32 %v697_v62, %v1347_v14  ;;  %v742_v14 = vld [vmem:[%s1489_s14 + $0x18] sm:$0xff]  ;;  %s1189_s14 = smov [#allocation12]  }
 0x556   :  { %1012 = vmatpush3.msra.mxu0 %v742_v14  ;;  %s846_s22 = sshll.u32 %s1189_s14, 4  ;;  %s847_s22 = int_to_ptr.vmem [resolvable:$true] %s846_s22 }
 0x557   :  { %v897_v1 = vmul.f32 -1.442695, %v700_v0  ;;  %1013 = vmatprep.subr.mxu0 %v1184_v3  ;;  %s1109_s5 = scalar_lea.vmem %s847_s22, 16  ;;  %s1113_s12 = scalar_lea.vmem %s847_s22, 32 }
 0x558   :  { %1014 = vmatpush3.msra.mxu0 %v741_v16  ;;  %p1110_p1 = scmp.ne.s32.totalorder %s847_s22, %s1109_s5  ;;  %p1114_p2 = scmp.lt.s32.totalorder %s847_s22, %s847_s22 }
 0x559   :  { %1039 = vpow2.f32 %v897_v1  ;;  %1015 = vmatprep.subr.mxu0 %v1184_v3  ;;  %p1115_p3 = scmp.lt.s32.totalorder %s1113_s12, %s1109_s5 }
 0x55a   :  { %1016 = vmatpush3.msra.mxu0 %v740_v10 }
 0x55b   :  { %1017 = vmatprep.subr.mxu0 %v1184_v3  ;;  %p1116_p4 = por %p1115_p3, %p1114_p2 }
 0x55c   :  { %1018 = vmatpush3.msra.mxu0 %v739_v17 }
 0x55d   :  { %p1117_p5 = pnand %p1116_p4, %p1110_p1 }
 0x566   :  { %v1040_v2 = vpop.eup %1039 }
 0x567   :  { %v704_v4 = vadd.f32 1.0, %v1040_v2 }
 0x569   :  { %1041 = vrcp.f32 %v704_v4 }
 0x576   :  { %v1042_v9 = vpop.eup %1041 }
 0x577   :  { %v711_v11 = vmul.f32 %v1042_v9, %v709_v7  ;;  %v718_v20 = vsub.f32 1.0, %v1042_v9 }
 0x579   :  { %713 = vrot.lane.b32.xlu1 %v711_v11, %s1186_s4 }
 0x57d   :  { %728 = vrot.lane.b32.xlu1 %v727_v12, %s1187_s9 }
 0x5eb   :  { %v714_v13 = vpop.permute.xlu1 %713 }
 0x5ec   :  { %v716_v15 = vadd.f32 %v714_v13, %v697_v62 }
 0x5ee   :  { %1043 = vtanh.f32 %v716_v15 }
 0x5ef   :  { %v729_v19 = vpop.permute.xlu1 %728 }
 0x5f0   :  { %v731_v22 = vmul.f32 %v1042_v9, %v729_v19 }
 0x5fb   :  { %v1044_v18 = vpop.eup %1043 }
 0x5fc   :  { %720 = vrot.lane.b32.xlu0 %v1044_v18, %s1188_s21 }
 0x66e   :  { %v721_v21 = vpop.permute.xlu0 %720 }
 0x66f   :  { %v723_v23 = vmul.f32 %v721_v21, %v718_v20 }
 0x671   :  { %v732_v24 = vadd.f32 %v731_v22, %v723_v23 }
 0x673   :  { %734 = vrot.lane.b32.xlu1 %v732_v24, %s1188_s21 }
 0x6e5   :  { %v735_v25 = vpop.permute.xlu1 %734 }
 0x6e6   :  { %1020 = vmatmul.mubr.msk.f32.vlgmr.msra.gmra.mxu0 %vm147_vm0, %v735_v25  ;;  %738 = vst.msk [vmem:[#allocation12] sm:$0x1] %vm737_vm4, %v735_v25 }
 0x7a6   :  { %v812_v27 = vpop.f32.mrf.mxu0 }
 0x7a7   :  { %v813_v3 = vadd.f32 %v812_v27, %v743_v26 }
 0x7a8   :  { %v1021_v28 = vpop.f32.mrf.mxu0 }
 0x7a9   :  { %v817_v29 = vsel %vm816_vm5, %v813_v3, -inf }
 0x7aa   :  { %818 = vmax.xlane.f32.xlu1 %v817_v29 }
 0x833   :  { %v819_v30 = vpop.xlane.xlu1 %818 }
 0x834   :  { %v820_v31 = vsub.f32 %v813_v3, %v819_v30 }
 0x836   :  { %v821_v32 = vmul.f32 1.442695, %v820_v31 }
 0x838   :  { %1045 = vpow2.f32 %v821_v32 }
 0x845   :  { %v1046_v33 = vpop.eup %1045 }
 0x846   :  { %v823_v34 = vsel %vm816_vm5, %v1046_v33, 0.0 }
 0x847   :  { %824 = vadd.xlane.f32.xlu0 %v823_v34 }
 0x848   :  { %1120 = shalt.err (!%p1117_p5)
}
 0x849   :  { %849 = dma.vmem_to_hbm [thread:$0]  %s847_s22, 16, %s1492_s17, [#allocation13]  }
 0x84a   :  { %s1190_s15 = smov [#allocation14]  }
 0x84b   :  { %s856_s8 = sshll.u32 %s1190_s15, 4  ;;  %s857_s8 = int_to_ptr.vmem [resolvable:$true] %s856_s8 }
 0x84c   :  { %s1129_s24 = scalar_lea.vmem %s857_s8, 16  ;;  %s1133_s25 = scalar_lea.vmem %s857_s8, 32 }
 0x84d   :  { %p1130_p6 = scmp.ne.s32.totalorder %s857_s8, %s1129_s24  ;;  %p1134_p7 = scmp.lt.s32.totalorder %s857_s8, %s857_s8 }
 0x84e   :  { %p1135_p8 = scmp.lt.s32.totalorder %s1133_s25, %s1129_s24 }
 0x850   :  { %p1136_p9 = por %p1135_p8, %p1134_p7 }
 0x852   :  { %p1137_p10 = pnand %p1136_p9, %p1130_p6 }
 0x854   :  { %1140 = shalt.err (!%p1137_p10)
}
 0x855   :  { %859 = dma.vmem_to_hbm [thread:$0]  %s857_s8, 16, %s1493_s18, [#allocation13]  }
 0x856   :  { %s1191_s29 = smov [#allocation11]  }
 0x857   :  { %s836_s17 = sshll.u32 %s1191_s29, 4  ;;  %s837_s17 = int_to_ptr.vmem [resolvable:$true] %s836_s17 }
 0x858   :  { %s1149_s4 = scalar_lea.vmem %s837_s17, 16  ;;  %s1153_s6 = scalar_lea.vmem %s837_s17, 32 }
 0x859   :  { %p1150_p11 = scmp.ne.s32.totalorder %s837_s17, %s1149_s4  ;;  %p1154_p12 = scmp.lt.s32.totalorder %s837_s17, %s837_s17 }
 0x85a   :  { %p1155_p13 = scmp.lt.s32.totalorder %s1153_s6, %s1149_s4 }
 0x85c   :  { %p1156_p0 = por %p1155_p13, %p1154_p12 }
 0x85e   :  { %p1157_p1 = pnand %p1156_p0, %p1150_p11 }
 0x8d0   :  { %v825_v35 = vpop.xlane.xlu0 %824 }
 0x8d1   :  { %1047 = vlog2.f32 %v825_v35 }
 0x8de   :  { %v1048_v36 = vpop.eup %1047 }
 0x8df   :  { %v827_v37 = vmul.f32 0.6931472, %v1048_v36 }
 0x8e1   :  { %v828_v38 = vsub.f32 %v820_v31, %v827_v37 }
 0x8e3   :  { %829 = vst.msk [vmem:[#allocation11] sm:$0x1] %vm816_vm5, %v828_v38 }
 0x8e4   :  { %1160 = shalt.err (!%p1157_p1)
}
 0x8e5   :  { %839 = dma.vmem_to_hbm [thread:$0]  %s837_s17, 16, %s1491_s16, [#allocation7]  }
 0x8e6   :  { %1175 = dma.done.wait [#allocation7], 16  }
 0x8e7   :  { %1176 = vsyncadd [#allocation7], 4294967280 }
 0x8e8   :  { %1177 = dma.done.wait [#allocation13], 32  }
 0x8e9   :  { %1178 = vsyncadd [#allocation13], 4294967264 }
 0x8ea   :  { %869 = vsyncpa [#allocation6], 1 }
 0x8eb   :  { %870 = vsyncpa [#allocation9], 1 }
 0x8ec   :  { %871 = vsyncpa [#allocation7], 1 }
 0x8ed   :  { %872 = vsyncpa [#allocation13], 1 }
 0x8ee   :  { %873 = vsyncmov [#allocation3] }
 0x8f1   :  { %s874_s28 = vpop.sfrf %873 }
 0x8f2   :  { %p899_p2 = scmp.ne.s32.totalorder %s874_s28, 0 }
 0x8f4   :  { %878 = shalt.err (%p899_p2)  }

</bundles_post_ra>
